<compile_context>
chip_gen: v7x
topology: tpu7x:2x2x1
jax: 0.10.0
libtpu: 0.0.40
codegen_flags: <defaults>
</compile_context>

<pallas_src>
import functools

import jax
import jax.numpy as jnp
from jax import lax
from jax.experimental import pallas as pl
from jax.experimental.pallas import tpu as pltpu


# Contract the LAST dims of both operands: (m, c) x (n, c) -> (m, n).
_NT_DIMS = (((1,), (1,)), ((), ()))


def _choose_tile_n(n, target=256):
    """Largest lane-aligned query tile <= target dividing n (or n itself).

    target=256 keeps ~4 live (TN, N) f32 temps under ~16 MiB at N=4096 (v7x
    budget); on v6e (128 MiB VMEM) a larger target (512-1024) can be passed.
    """
    if n <= target or n % 128 != 0:
        return n
    t = (target // 128) * 128
    while t >= 128:
        if n % t == 0:
            return t
        t -= 128
    return n


def _graph_conv_kernel(xq_ref, xk_ref, wl_ref, wd_ref, b_ref, o_ref, *, k, mxu_dtype):
    # xq_ref: (TN, C)   query rows of this tile (channel-last)
    # xk_ref: (N,  C)   all points of this batch (keys)
    # wl_ref: (C_out, C)  "local" weight (applied to neighbor - center)
    # wd_ref: (C_out, C)  combined center weight (Wg - Wl)
    # b_ref:  (C_out, 1)  bias
    # o_ref:  (C_out, TN) output block, lane-dense over the point axis
    f32 = jnp.float32
    md = f32 if mxu_dtype is None else mxu_dtype

    x_q = xq_ref[...].astype(f32)                      # (TN, C)
    x_k = xk_ref[...].astype(f32)                      # (N, C)
    w_l = wl_ref[...].astype(f32)                      # (C_out, C)
    w_d = wd_ref[...].astype(f32)                      # (C_out, C)
    b = b_ref[...].astype(f32)                         # (C_out, 1)

    tn = x_q.shape[0]
    n = x_k.shape[0]

    # Neighbor ranking score:  argmax_j -||x_i - x_j||^2 == argmax_j (2 x_i.x_j - ||x_j||^2)
    # (the ||x_i||^2 term is constant per query row, so it is dropped).
    inner = lax.dot_general(x_q.astype(md), x_k.astype(md), _NT_DIMS,
                            preferred_element_type=f32)          # (TN, N)
    xx_k = jnp.sum(x_k * x_k, axis=-1, keepdims=True)            # (N, 1)
    score = 2.0 * inner - xx_k.T                                 # (TN, N)

    # Hoisted projections (edge @ [Wl;Wg]^T + b == nbr@Wl^T + x@(Wg-Wl)^T + b),
    # kept transposed so the accumulator / output block is (C_out, TN).
    x_wl_t = lax.dot_general(w_l.astype(md), x_k.astype(md), _NT_DIMS,
                             preferred_element_type=f32).astype(md)   # (C_out, N)
    center_t = lax.dot_general(w_d, x_q, _NT_DIMS,
                               preferred_element_type=f32) + b        # (C_out, TN)

    col = lax.broadcasted_iota(jnp.int32, (tn, n), 1)

    def body(_, carry):
        score, acc = carry
        # First-occurrence argmax over the key (lane) axis — matches top_k tie-break.
        m = jnp.max(score, axis=-1, keepdims=True)                          # (TN, 1)
        first = jnp.min(jnp.where(score >= m, col, n), axis=-1, keepdims=True)
        one_hot = col == first                                              # (TN, N) bool
        # Gather in projected space on the MXU: (C_out, N) x (TN, N)^T -> (C_out, TN).
        oh = one_hot.astype(f32).astype(md)        # bool->f32 (->bf16) cast
        nbr_t = lax.dot_general(x_wl_t, oh, _NT_DIMS, preferred_element_type=f32)
        acc = jnp.maximum(acc, nbr_t + center_t)
        score = jnp.where(one_hot, -jnp.inf, score)                         # mask picked column
        return score, acc

    acc0 = jnp.full(o_ref.shape, -jnp.inf, dtype=f32)
    _, acc = lax.fori_loop(0, k, body, (score, acc0))

    o_ref[...] = acc.astype(o_ref.dtype)


def graph_conv2d_forward(x_bcn, weight, bias, *, k, tile_n=None, mxu_dtype=None):
    """DGCNN edge-conv forward.

    x_bcn: (B, C_in, N) torch layout; weight: (C_out, 2*C_in); bias: (C_out,).
    Returns (B, C_out, N).  `mxu_dtype=jnp.bfloat16` enables bf16 MXU operands
    (v6e / v7x fast path); accumulation stays f32.
    """
    B, C, N = x_bcn.shape
    C_out = weight.shape[0]
    assert weight.shape[1] == 2 * C, "local+global doubles the channel count"
    assert 1 <= k <= N, "k must be in [1, N] (knn includes the point itself)"

    tn = tile_n if tile_n is not None else _choose_tile_n(N)
    assert N % tn == 0, (N, tn)
    assert tn == N or tn % 128 == 0, "partial query tiles must be lane-aligned"

    # Channel-last for the distance/gather math; weights stay in torch layout
    # (C_out, C) so all matmuls are NT-form and no transposes appear in-kernel.
    x_bnc = jnp.transpose(x_bcn, (0, 2, 1))           # (B, N, C)
    w_l = weight[:, :C]                               # (C_out, C) local half
    w_d = weight[:, C:] - w_l                         # (C_out, C) center term x@(Wg-Wl)
    b_col = bias.reshape(C_out, 1)

    grid = (B, N // tn)

    # Rough VMEM working set: the (tn, N) score/one-hot temps dominate.  Only
    # raise the scoped limit when the 32 MiB default would be exceeded (cap at
    # v7x's 64 MiB physical VMEM).
    est_bytes = 4 * (4 * tn * N + 2 * (tn * C + N * C + C_out * tn) + 4 * C_out * C)
    vmem_limit = None
    if est_bytes > 32 * 1024 * 1024:
        vmem_limit = int(min(64 * 1024 * 1024, 2 * est_bytes))

    flops = int(2 * B * N * N * (C + k * C_out)       # distance + k one-hot gathers
                + 4 * B * N * C * C_out)              # per-tile projections
    bytes_accessed = int(4 * B * N * (C * (1 + N // tn) + C_out)
                         + 4 * (2 * C_out * C + C_out))
    cost = pl.CostEstimate(flops=flops, transcendentals=0, bytes_accessed=bytes_accessed)

    out = pl.pallas_call(
        functools.partial(_graph_conv_kernel, k=k, mxu_dtype=mxu_dtype),
        out_shape=jax.ShapeDtypeStruct((B, C_out, N), x_bcn.dtype),
        grid_spec=pltpu.PrefetchScalarGridSpec(
            num_scalar_prefetch=0,
            grid=grid,
            in_specs=[
                pl.BlockSpec((None, tn, C), lambda b, q: (b, q, 0)),   # query tile
                pl.BlockSpec((None, N, C), lambda b, q: (b, 0, 0)),    # full key set
                pl.BlockSpec((C_out, C), lambda b, q: (0, 0)),         # W_local
                pl.BlockSpec((C_out, C), lambda b, q: (0, 0)),         # W_global - W_local
                pl.BlockSpec((C_out, 1), lambda b, q: (0, 0)),         # bias
            ],
            out_specs=pl.BlockSpec((None, C_out, tn), lambda b, q: (b, 0, q)),
        ),
        compiler_params=pltpu.CompilerParams(
            dimension_semantics=("parallel", "parallel"),
            vmem_limit_bytes=vmem_limit,
        ),
        cost_estimate=cost,
    )(x_bnc, x_bnc, w_l, w_d, b_col)

    return out  # already (B, C_out, N): no wrapper output transpose


def reference_forward(x_bcn, weight, bias, *, k):
    """Pure-JAX reference mirroring the PyTorch module (local+global, max reduce)."""
    x = jnp.transpose(x_bcn, (0, 2, 1)).astype(jnp.float32)    # (B, N, C)
    xx = jnp.sum(x * x, axis=-1, keepdims=True)
    inner = jnp.einsum("bnc,bmc->bnm", x, x)
    neg_dist = 2.0 * inner - xx - jnp.swapaxes(xx, 1, 2)
    idx = lax.top_k(neg_dist, k)[1]                            # (B, N, k)
    feats = jax.vmap(lambda xb, ib: xb[ib])(x, idx)            # (B, N, k, C)
    center = jnp.broadcast_to(x[:, :, None, :], feats.shape)
    edge = jnp.concatenate([feats - center, center], axis=-1)  # (B, N, k, 2C)
    y = jnp.einsum("bnkc,oc->bnko", edge, weight) + bias       # (B, N, k, C_out)
    out = jnp.max(y, axis=2)                                   # (B, N, C_out)
    return jnp.transpose(out, (0, 2, 1))                       # (B, C_out, N)


if __name__ == "__main__":
    # Small config: B=2, C_in=4, N=16 points, k=4 neighbors, C_out=8.
    B, C_IN, N, K, C_OUT = 2, 4, 16, 4, 8

    key = jax.random.PRNGKey(0)
    kx, kw, kb = jax.random.split(key, 3)
    x = jax.random.normal(kx, (B, C_IN, N), dtype=jnp.float32)          # torch (B, C, N)
    # Conv2d weight (C_out, 2*C_in, 1, 1) -> squeezed to (C_out, 2*C_in); bias (C_out,)
    weight = 0.2 * jax.random.normal(kw, (C_OUT, 2 * C_IN), dtype=jnp.float32)
    bias = 0.1 * jax.random.normal(kb, (C_OUT,), dtype=jnp.float32)
    # TODO(synk): only the module defaults are implemented (features='local+global',
    # reduction='max', norm_layer=None, activation_layer=None); 'mean'/'local'/'global'
    # variants are not.

    # f32 path: strict check against the pure-JAX reference.
    out = graph_conv2d_forward(x, weight, bias, k=K)
    out = jax.block_until_ready(out)
    ref = reference_forward(x, weight, bias, k=K)
    assert out.shape == (B, C_OUT, N), out.shape
    assert jnp.allclose(out, ref, rtol=1e-4, atol=1e-4), float(jnp.max(jnp.abs(out - ref)))

    # bf16 MXU-operand path (v6e/v7x fast path): distance ordering can differ on
    # near-tied neighbors, so only sanity-check shape / finiteness here.
    out_bf16 = graph_conv2d_forward(x, weight, bias, k=K, mxu_dtype=jnp.bfloat16)
    out_bf16 = jax.block_until_ready(out_bf16)
    assert out_bf16.shape == (B, C_OUT, N), out_bf16.shape
    assert bool(jnp.all(jnp.isfinite(out_bf16)))

    print("KERNEL_OK")
</pallas_src>

<mosaic_0001>
module attributes {stable_mosaic.version = 11 : i64} {
  func.func @_graph_conv_kernel(%arg0: i32, %arg1: i32, %arg2: memref<1x16x4xf32, #tpu.memory_space<vmem>>, %arg3: memref<1x16x4xf32, #tpu.memory_space<vmem>>, %arg4: memref<8x4xf32, #tpu.memory_space<vmem>>, %arg5: memref<8x4xf32, #tpu.memory_space<vmem>>, %arg6: memref<8x1xf32, #tpu.memory_space<vmem>>, %arg7: memref<1x8x16xf32, #tpu.memory_space<vmem>>) attributes {dimension_semantics = [#tpu.dimension_semantics<parallel>, #tpu.dimension_semantics<parallel>], iteration_bounds = array<i64: 2, 1>, scalar_prefetch = 0 : i64, scratch_operands = 0 : i64, tpu.core_type = #tpu.core_type<tc>, window_params = [{transform_indices = @transform_0, window_bounds = array<i64: 1, 16, 4>}, {transform_indices = @transform_1, window_bounds = array<i64: 1, 16, 4>}, {pipeline_mode = #tpu.pipeline_mode<synchronous>, transform_indices = @transform_2, window_bounds = array<i64: 8, 4>}, {pipeline_mode = #tpu.pipeline_mode<synchronous>, transform_indices = @transform_3, window_bounds = array<i64: 8, 4>}, {pipeline_mode = #tpu.pipeline_mode<synchronous>, transform_indices = @transform_4, window_bounds = array<i64: 8, 1>}, {transform_indices = @transform_5, window_bounds = array<i64: 1, 8, 16>}]} {
    %c0 = arith.constant 0 : index
    %c0_0 = arith.constant 0 : index
    %c0_1 = arith.constant 0 : index
    %0 = vector.load %arg2[%c0, %c0_0, %c0_1] : memref<1x16x4xf32, #tpu.memory_space<vmem>>, vector<1x16x4xf32>
    %1 = vector.shape_cast %0 : vector<1x16x4xf32> to vector<16x4xf32>
    %c0_2 = arith.constant 0 : index
    %c0_3 = arith.constant 0 : index
    %c0_4 = arith.constant 0 : index
    %2 = vector.load %arg3[%c0_2, %c0_3, %c0_4] : memref<1x16x4xf32, #tpu.memory_space<vmem>>, vector<1x16x4xf32>
    %3 = vector.shape_cast %2 : vector<1x16x4xf32> to vector<16x4xf32>
    %c0_5 = arith.constant 0 : index
    %c0_6 = arith.constant 0 : index
    %4 = vector.load %arg4[%c0_5, %c0_6] : memref<8x4xf32, #tpu.memory_space<vmem>>, vector<8x4xf32>
    %c0_7 = arith.constant 0 : index
    %c0_8 = arith.constant 0 : index
    %5 = vector.load %arg5[%c0_7, %c0_8] : memref<8x4xf32, #tpu.memory_space<vmem>>, vector<8x4xf32>
    %c0_9 = arith.constant 0 : index
    %c0_10 = arith.constant 0 : index
    %6 = vector.load %arg6[%c0_9, %c0_10] : memref<8x1xf32, #tpu.memory_space<vmem>>, vector<8x1xf32>
    %cst = arith.constant dense<0.000000e+00> : vector<16x16xf32>
    %7 = tpu.matmul %1, %3, %cst {dimension_numbers = #tpu.dot_dimension_numbers<[1], [1], [0], [0], [0, 0, 1, 0], [], []>} : vector<16x4xf32>, vector<16x4xf32>, vector<16x16xf32> -> vector<16x16xf32>
    %8 = arith.mulf %3, %3 : vector<16x4xf32>
    %cst_11 = arith.constant dense<0.000000e+00> : vector<16xf32>
    %9 = vector.multi_reduction <add>, %8, %cst_11 [1] : vector<16x4xf32> to vector<16xf32>
    %10 = vector.shape_cast %9 : vector<16xf32> to vector<16x1xf32>
    %cst_12 = arith.constant 2.000000e+00 : f32
    %11 = vector.broadcast %cst_12 : f32 to vector<16x16xf32>
    %12 = arith.mulf %11, %7 : vector<16x16xf32>
    %13 = tpu.transpose %10, [1, 0] : vector<16x1xf32> -> vector<1x16xf32>
    %14 = vector.broadcast %13 : vector<1x16xf32> to vector<16x16xf32>
    %15 = arith.subf %12, %14 : vector<16x16xf32>
    %cst_13 = arith.constant dense<0.000000e+00> : vector<8x16xf32>
    %16 = tpu.matmul %4, %3, %cst_13 {dimension_numbers = #tpu.dot_dimension_numbers<[1], [1], [0], [0], [0, 0, 1, 0], [], []>} : vector<8x4xf32>, vector<16x4xf32>, vector<8x16xf32> -> vector<8x16xf32>
    %cst_14 = arith.constant dense<0.000000e+00> : vector<8x16xf32>
    %17 = tpu.matmul %5, %1, %cst_14 {dimension_numbers = #tpu.dot_dimension_numbers<[1], [1], [0], [0], [0, 0, 1, 0], [], []>} : vector<8x4xf32>, vector<16x4xf32>, vector<8x16xf32> -> vector<8x16xf32>
    %18 = vector.broadcast %6 : vector<8x1xf32> to vector<8x16xf32>
    %19 = arith.addf %17, %18 : vector<8x16xf32>
    %20 = tpu.iota {dimensions = array<i32: 1>} : vector<16x16xi32>
    %cst_15 = arith.constant 0xFF800000 : f32
    %21 = vector.broadcast %cst_15 : f32 to vector<8x16xf32>
    %c0_i32 = arith.constant 0 : i32
    %c4_i32 = arith.constant 4 : i32
    %22 = arith.addi %c0_i32, %c4_i32 : i32
    %c1_i32 = arith.constant 1 : i32
    %23:2 = scf.for %arg8 = %c0_i32 to %22 step %c1_i32 iter_args(%arg9 = %15, %arg10 = %21) -> (vector<16x16xf32>, vector<8x16xf32>)  : i32 {
      %cst_19 = arith.constant dense<0xFF800000> : vector<16xf32>
      %27 = vector.multi_reduction <maximumf>, %arg9, %cst_19 [1] : vector<16x16xf32> to vector<16xf32>
      %28 = vector.shape_cast %27 : vector<16xf32> to vector<16x1xf32>
      %29 = vector.broadcast %28 : vector<16x1xf32> to vector<16x16xf32>
      %30 = arith.cmpf oge, %arg9, %29 : vector<16x16xf32>
      %c16_i32 = arith.constant 16 : i32
      %31 = vector.broadcast %c16_i32 : i32 to vector<16x16xi32>
      %32 = arith.select %30, %20, %31 : vector<16x16xi1>, vector<16x16xi32>
      %cst_20 = arith.constant dense<2147483647> : vector<16xi32>
      %33 = vector.multi_reduction <minsi>, %32, %cst_20 [1] : vector<16x16xi32> to vector<16xi32>
      %34 = vector.shape_cast %33 : vector<16xi32> to vector<16x1xi32>
      %35 = vector.broadcast %34 : vector<16x1xi32> to vector<16x16xi32>
      %36 = arith.cmpi eq, %20, %35 : vector<16x16xi32>
      %37 = arith.extui %36 : vector<16x16xi1> to vector<16x16xi32>
      %38 = arith.sitofp %37 : vector<16x16xi32> to vector<16x16xf32>
      %cst_21 = arith.constant dense<0.000000e+00> : vector<8x16xf32>
      %39 = tpu.matmul %16, %38, %cst_21 {dimension_numbers = #tpu.dot_dimension_numbers<[1], [1], [0], [0], [0, 0, 1, 0], [], []>} : vector<8x16xf32>, vector<16x16xf32>, vector<8x16xf32> -> vector<8x16xf32>
      %40 = arith.addf %39, %19 : vector<8x16xf32>
      %41 = arith.maximumf %arg10, %40 : vector<8x16xf32>
      %cst_22 = arith.constant 0xFF800000 : f32
      %42 = vector.broadcast %cst_22 : f32 to vector<16x16xf32>
      %43 = arith.select %36, %42, %arg9 : vector<16x16xi1>, vector<16x16xf32>
      scf.yield %43, %41 : vector<16x16xf32>, vector<8x16xf32>
    }
    %c0_16 = arith.constant 0 : index
    %c0_17 = arith.constant 0 : index
    %c0_18 = arith.constant 0 : index
    %24 = vector.load %arg7[%c0_16, %c0_17, %c0_18] : memref<1x8x16xf32, #tpu.memory_space<vmem>>, vector<1x8x16xf32>
    %25 = vector.shape_cast %24 : vector<1x8x16xf32> to vector<8x16xf32>
    %26 = vector.shape_cast %23#1 : vector<8x16xf32> to vector<1x8x16xf32>
    tpu.vector_store %arg7[%c0_16, %c0_17, %c0_18], %26 {strides = array<i32>} : memref<1x8x16xf32, #tpu.memory_space<vmem>>, vector<1x8x16xf32>,
    return
  }
  func.func @transform_0(%arg0: i32, %arg1: i32) -> (i32, i32, i32) {
    %c0_i32 = arith.constant 0 : i32
    %c0_i32_0 = arith.constant 0 : i32
    return %arg0, %arg1, %c0_i32 : i32, i32, i32
  }
  func.func @transform_1(%arg0: i32, %arg1: i32) -> (i32, i32, i32) {
    %c0_i32 = arith.constant 0 : i32
    %c0_i32_0 = arith.constant 0 : i32
    %c0_i32_1 = arith.constant 0 : i32
    return %arg0, %c0_i32, %c0_i32_0 : i32, i32, i32
  }
  func.func @transform_2(%arg0: i32, %arg1: i32) -> (i32, i32) {
    %c0_i32 = arith.constant 0 : i32
    %c0_i32_0 = arith.constant 0 : i32
    %c0_i32_1 = arith.constant 0 : i32
    return %c0_i32, %c0_i32_0 : i32, i32
  }
  func.func @transform_3(%arg0: i32, %arg1: i32) -> (i32, i32) {
    %c0_i32 = arith.constant 0 : i32
    %c0_i32_0 = arith.constant 0 : i32
    %c0_i32_1 = arith.constant 0 : i32
    return %c0_i32, %c0_i32_0 : i32, i32
  }
  func.func @transform_4(%arg0: i32, %arg1: i32) -> (i32, i32) {
    %c0_i32 = arith.constant 0 : i32
    %c0_i32_0 = arith.constant 0 : i32
    %c0_i32_1 = arith.constant 0 : i32
    return %c0_i32, %c0_i32_0 : i32, i32
  }
  func.func @transform_5(%arg0: i32, %arg1: i32) -> (i32, i32, i32) {
    %c0_i32 = arith.constant 0 : i32
    %c0_i32_0 = arith.constant 0 : i32
    return %arg0, %c0_i32, %arg1 : i32, i32, i32
  }
}

</mosaic_0001>

<bundles_post_ra>
// kernel: tpu_custom_call.1
= control target key start
LH: loop header
LB: loop body
LE: loop exit
PB: predicated region body
PF: predicated region fallthrough
CT: control target
= control target key end

     0   :  { %10 = vsyncpa [#allocation3], 0  ;;  %s1357_s0 = inlined_call_operand.vmem [shape: f32[2,16,4], index: 0, kind: input, shape index: {}]   ;;  %s1358_s1 = inlined_call_operand.vmem [shape: f32[2,16,4], index: 1, kind: input, shape index: {}]   ;;  %s1359_s2 = inlined_call_operand.vmem [shape: f32[8,4], index: 2, kind: input, shape index: {}]   ;;  %s1360_s3 = inlined_call_operand.vmem [shape: f32[8,4], index: 3, kind: input, shape index: {}]   ;;  %s1361_s4 = inlined_call_operand.vmem [shape: f32[8,1], index: 4, kind: input, shape index: {}]   ;;  %s1362_s5 = inlined_call_operand.hbm [shape: f32[2,8,16], index: 5, kind: output, shape index: {}]  }
   0x1   :  { %12 = vsyncpa [#allocation3 + $0x1], 0  ;;  %s1160_s18 = smov 0   ;;  %s1162_s19 = smov 0  }
   0x2   :  { %s1164_s20 = smov 0   ;;  %s1166_s21 = smov 0  }
   0x3   :  { %s1168_s22 = smov 0   ;;  %s1170_s23 = smov 0  }
   0x4 LB: > { %s824_s24 = sadd.s32 4294967295, %s1104_s23   ;;  %s825_s25 = sadd.s32 4294967294, %s1104_s23   ;;  %s1104_s23 = sphi %s1170_s23, %s18_s23   ;;  %s1100_s22 = sphi %s1168_s22, %s1372_s22   ;;  %s1096_s21 = sphi %s1166_s21, %s1371_s21   ;;  %s1092_s20 = sphi %s1164_s20, %s1370_s20   ;;  %s1088_s19 = sphi %s1162_s19, %s1369_s19   ;;  %s1084_s18 = sphi %s1160_s18, %s1368_s18  }
   0x5   : > { %s30_s26 = sadd.s32 1, %s1100_s22  ;;  %s156_s27 = sadd.s32 1, %s1092_s20 }
   0x6   : > { %p32_p0 = scmp.ge.s32.totalorder %s30_s26, 2  ;;  %p166_p1 = scmp.ne.s32.totalorder %s1092_s20, %s1088_s19 }
   0x7   : > { %p167_p2 = scmp.eq.s32.totalorder %s824_s24, 1  ;;  %p172_p3 = scmp.ne.s32.totalorder %s1088_s19, %s1084_s18 }
   0x8   : > { %s1374_s26 = smov (%p32_p0, %s30_s26), 0  ;;  %p173_p5 = scmp.eq.s32.totalorder %s825_s25, 1 }
   0x9   : > { %p1200_p4 = por %p167_p2, %p166_p1  ;;  %s151_s29 = ssub.s32 %s1100_s22, %s1374_s26 }
   0xa   : > { %p828_p6 = scmp.ge.s32.totalorder %s1104_s23, 1  ;;  %p154_p7 = scmp.eq.s32.totalorder %s151_s29, 0 }
   0xb   : > { %p1207_p8 = por %p173_p5, %p172_p3  ;;  %p221_p9 = scmp.lt.s32.totalorder %s1104_s23, 3 }
   0xc   : > { %s1213_s6 = scalar_select %p154_p7, %s1092_s20, %s156_s27  }
   0xd   : > { %p222_p10 = pnand %p828_p6, %p221_p9 }
   0xe   : > { %p259_p11 = scmp.lt.s32.totalorder (!%p222_p10), %s1096_s21, 1  ;;  %s255_s7 = sand.u32 (!%p222_p10), 1, %s1088_s19   ;;  %v1122_v0 = vmov (!%p222_p10), 0.0|0.0   ;;  %vm1123_vm0 = vmmov (!%p222_p10), 0   ;;  %v1124_v1 = vmov (!%p222_p10), 0.0   ;;  %vm280_vm1 = vcmask (!%p222_p10), 31744  }
   0xf   : > { %225 = sbr.rel (%p222_p10) target bundleno = 990 (0x3de), region = 40  ;;  %s1219_s8 = sshll.u32 (!%p222_p10), %s255_s7, 3  ;;  %902 = vmatprep.subr.bf16.mxu1 (!%p222_p10), %v1122_v0  ;;  %879 = vmatprep.mubr.msk.f32.mxu1 (!%p222_p10), %vm1123_vm0, %v1124_v1  ;;  %v1125_v2 = vmov (!%p222_p10), 0   ;;  %v279_v3 = vld [vmem:[%s1361_s4] sm:$0xff] (!%p222_p10)  ;;  %vm1231_vm2 = vmpackc.low (!%p222_p10), %vm280_vm1, %vm280_vm1  ;;  %v410_v17 = vlaneseq (!%p222_p10)  ;;  %v1266_v37 = vmov (!%p222_p10), -inf  }
  0x10   : > { %1008 = vset.pattern.permute.xlu1 (!%p222_p10), %v1125_v2  ;;  %1009 = vset.pattern.permute.xlu0 (!%p222_p10), %v1125_v2  ;;  %v277_v14 = vld [vmem:[%s1359_s2] sm:$0xff] (!%p222_p10)  ;;  %s257_s10 = scalar_lea.vmem (!%p222_p10), [#allocation2], %s1219_s8  ;;  %s1272_s11 = smov (!%p222_p10), 0  }
  0x11   : > { %491 = vperm.xlu1 (!%p222_p10), %1008, %v279_v3   ;;  %v278_v16 = vld [vmem:[%s1360_s3] sm:$0xff] (!%p222_p10)  ;;  %v1259_v18 = vand.u32 (!%p222_p10), 127, %v410_v17  ;;  %v411_v29 = vshrl.u32 (!%p222_p10), %v410_v17, 7 }
  0x13   : > { %v412_v30 = vsub.s32 (!%p222_p10), 0, %v411_v29 }
  0x16   : > { %s260_s9 = scalar_select %p259_p11, %s1096_s21, 1 }
  0x18   : > { %s853_s12 = sshll.u32 %s260_s9, 4 }
  0x19   : > { %s272_s15 = scalar_lea.vmem %s1358_s1, %s853_s12  ;;  %s266_s24 = scalar_lea.vmem %s1357_s0, %s853_s12 }
  0x1a   : > { %v275_v5 = vld [vmem:[%s272_s15] sm:$0xff]  ;;  %v276_v6 = vld [vmem:[%s272_s15 + $0x8] sm:$0xff] }
  0x1b   : > { %v273_v7 = vld [vmem:[%s266_s24] sm:$0xff]  ;;  %v368_v8 = vmul.f32 %v275_v5, %v275_v5  ;;  %v896_v9 = vpack.c.bf16 %v276_v6, %v275_v5  ;;  %v369_v10 = vmul.f32 %v276_v6, %v276_v6  ;;  %v274_v13 = vld [vmem:[%s266_s24 + $0x8] sm:$0xff] }
  0x1c   : > { %872 = vmatprep.mubr.msk.f32.mxu0 %vm280_vm1, %v273_v7  ;;  %v907_v15 = vpack.c.bf16 %v274_v13, %v273_v7 }
  0x1d   : > { %v370_v11 = vsel %vm280_vm1, %v368_v8, 0.0  ;;  %898 = vmatprep.subr.msk.bf16.mxu0 %vm1231_vm2, %v896_v9  ;;  %905 = vmatpush3.bf16.xpose.msk.msra.mxu1 %vm1231_vm2, %v896_v9  ;;  %v373_v12 = vsel %vm280_vm1, %v369_v10, 0.0 }
  0x1e   : > { %371 = vadd.xlane.f32.xlu0 %v370_v11  ;;  %901 = vmatpush3.bf16.xpose.msk.msra.mxu0 %vm1231_vm2, %v896_v9 }
  0x1f   : > { %906 = vmatprep.subr.bf16.mxu0 %v1122_v0 }
  0x22   : > { %374 = vadd.xlane.f32.xlu0 %v373_v12 }
  0x24   : > { %880 = vmatmul.mubr.msk.f32.vlgmr.msra.gmra.mrb[0].mxu1 %vm280_vm1, %v277_v14 }
  0x25   : > { %873 = vmatmul.mubr.msk.f32.vlgmr.msra.gmra.mrb[0].mxu0 %vm280_vm1, %v274_v13 }
  0x26   : > { %909 = vmatpush3.bf16.xpose.msk.msra.mxu0 %vm1231_vm2, %v907_v15  ;;  %886 = vmatprep.mubr.msk.f32.mxu0 %vm1123_vm0, %v1124_v1 }
  0x2d   : > { %887 = vmatmul.mubr.msk.f32.vlgmr.msra.gmra.mrb[2].mxu0 %vm280_vm1, %v278_v16 }
  0x90   : > { %v492_v25 = vpop.permute.xlu1 %491 }
  0xab   : > { %v372_v19 = vpop.xlane.xlu0 %371 }
  0xac   : > { %378 = vxpose.xlu1.b32.start [1/2] (short) (narrow) %v372_v19, 8 }
  0xaf   : > { %v375_v20 = vpop.xlane.xlu0 %374 }
  0xb0   : > { %379 = vxpose.xlu1.b32.end [2/2] (short) (narrow) %v375_v20, 8 }
  0xf7   : > { %v1261_v21 = vpop.f32.mrb[0].mxu1 }
  0xf8   : > { %v874_v22 = vpop.f32.mrb[0].mxu0  ;;  %v881_v23 = vpop.f32.mrb[1].mxu1 }
  0xf9   : > { %v359_v24 = vpop.f32.mrb[1].mxu0  ;;  %v377_v32 = vmul.f32 2.0, %v874_v22 }
  0xfa   : > { %v376_v33 = vmul.f32 2.0, %v359_v24 }
 0x100   : > { %v563_v26 = vpop.f32.mrb[2].mxu0 }
 0x101   : > { %v1263_v27 = vadd.f32 %v563_v26, %v492_v25  ;;  %v888_v28 = vpop.f32.mrb[3].mxu0 }
 0x12c   : > { %v394_v31 = vpop.trf.xlu1 }
 0x12d   : > { %v413_v34 = vrot.slane %v394_v31, %v412_v30 }
 0x12f   : > { %v414_v35 = vsub.f32 %v376_v33, %v413_v34   ;;  %v415_v36 = vsub.f32 %v377_v32, %v413_v34  }
 0x130 LB: >> { %vm578_vm3 = vcmask 130048   ;;  %v1126_v58 = vmov 0.0|0.0   ;;  %vm1127_vm8 = vmmov 0   ;;  %v1128_v59 = vmov 0.0   ;;  %s574_s11 = sadd.s32 1, %s1120_s11   ;;  %s1120_s11 = sphi %s1272_s11, %s574_s11   ;;  %v1116_v35 = vphi %v414_v35, %v705_v35   ;;  %v1112_v36 = vphi %v415_v36, %v706_v36   ;;  %v1108_v37 = vphi %v1266_v37, %v1367_v37  }
 0x131   : >> { %v579_v38 = vsel %vm578_vm3, %v1116_v35, -inf  ;;  %v582_v39 = vsel %vm578_vm3, %v1112_v36, -inf  ;;  %910 = vmatprep.subr.bf16.mxu0 %v1126_v58  ;;  %893 = vmatprep.mubr.msk.f32.mxu0 %vm1127_vm8, %v1128_v59  ;;  %vm912_vm11 = vmpackc.low %vm578_vm3, %vm578_vm3  ;;  %p571_p12 = scmp.ge.s32.totalorder %s574_s11, 4  }
 0x132   : >> { %580 = vmax.xlane.f32.xlu0 %v579_v38  ;;  %s850_s12 = sshll.u32 (%p571_p12), %s1096_s21, 7  ;;  %s724_s16 = sshll.u32 (%p571_p12), %s257_s10, 4  ;;  %s725_s16 = int_to_ptr.vmem [resolvable:$true] %s724_s16 }
 0x133   : > { %s1312_s15 = scalar_lea.hbm (%p571_p12), %s1362_s5, %s850_s12  ;;  %s710_s17 = scalar_lea.sflag (%p571_p12), [#allocation3], %s255_s7 }
 0x134   : > { %s1010_s24 = scalar_lea.vmem (%p571_p12), %s725_s16, 128  ;;  %s1129_s25 = smov (%p571_p12), [#allocation2]  }
 0x135   : > { %p1011_p13 = scmp.ne.s32.totalorder (%p571_p12), %s725_s16, %s1010_s24  ;;  %s1014_s27 = sshll.u32 (%p571_p12), %s1129_s25, 4  ;;  %s1015_s27 = int_to_ptr.vmem [resolvable:$false] %s1014_s27 }
 0x136   : >> { %583 = vmax.xlane.f32.xlu0 %v582_v39  ;;  %s1016_s29 = scalar_lea.vmem (%p571_p12), %s1015_s27, 256  ;;  %p1017_p2 = scmp.lt.s32.totalorder (%p571_p12), %s725_s16, %s1015_s27 }
 0x137   : > { %p1012_p0 = pnand (%p571_p12), %p1011_p13, %p1200_p4  ;;  %p1018_p3 = scmp.lt.s32.totalorder (%p571_p12), %s1016_s29, %s1010_s24 }
 0x139   : > { %p1013_p1 = pneg (%p571_p12), %p1012_p0  ;;  %p1019_p5 = por (%p571_p12), %p1018_p3, %p1017_p2 }
 0x13b   : > { %p1020_p6 = pnand (%p571_p12), %p1019_p5, %p1013_p1 }
 0x1bf   : >> { %v581_v40 = vpop.xlane.xlu0 %580 }
 0x1c0   : >> { %vm585_vm4 = vcmp.ge.f32.partialorder %v1116_v35, %v581_v40 }
 0x1c1   : >> { %v587_v41 = vsel %vm585_vm4, %v1259_v18, 16 }
 0x1c2   : >> { %v589_v42 = vsel %vm578_vm3, %v587_v41, 2147483647 }
 0x1c3   : >> { %v584_v43 = vpop.xlane.xlu0 %583  ;;  %v591_v44 = vshra.s32 %v589_v42, 16  ;;  %v590_v50 = vand.u32 65535, %v589_v42 }
 0x1c4   : >> { %vm586_vm5 = vcmp.ge.f32.partialorder %v1112_v36, %v584_v43 }
 0x1c5   : >> { %v588_v45 = vsel %vm586_vm5, %v1259_v18, 16  ;;  %v593_v46 = vcvt.s32.f32 %v591_v44  ;;  %v592_v53 = vcvt.s32.f32 %v590_v50 }
 0x1c6   : >> { %v604_v47 = vsel %vm578_vm3, %v588_v45, 2147483647 }
 0x1c7   : >> { %594 = vmin.xlane.f32.xlu1 %v593_v46  ;;  %v606_v48 = vshra.s32 %v604_v47, 16  ;;  %v605_v51 = vand.u32 65535, %v604_v47 }
 0x1c9   : >> { %v608_v49 = vcvt.s32.f32 %v606_v48  ;;  %v607_v56 = vcvt.s32.f32 %v605_v51 }
 0x1cb   : >> { %609 = vmin.xlane.f32.xlu1 %v608_v49 }
 0x254   : >> { %v595_v52 = vpop.xlane.xlu1 %594 }
 0x255   : >> { %vm596_vm6 = vcmp.eq.f32.partialorder %v593_v46, %v595_v52  ;;  %v601_v60 = vcvt.f32.s32 %v595_v52 }
 0x256   : >> { %v597_v54 = vsel %vm596_vm6, %v592_v53, inf }
 0x257   : >> { %598 = vmin.xlane.f32.xlu0 %v597_v54  ;;  %v602_v62 = vshll.u32 %v601_v60, 16 }
 0x258   : >> { %v610_v55 = vpop.xlane.xlu1 %609 }
 0x259   : >> { %vm611_vm7 = vcmp.eq.f32.partialorder %v608_v49, %v610_v55  ;;  %v616_v63 = vcvt.f32.s32 %v610_v55 }
 0x25a   : >> { %v612_v57 = vsel %vm611_vm7, %v607_v56, inf }
 0x25b   : >> { %613 = vmin.xlane.f32.xlu1 %v612_v57  ;;  %v617_v3 = vshll.u32 %v616_v63, 16 }
 0x2e4   : >> { %v599_v61 = vpop.xlane.xlu0 %598 }
 0x2e5   : >> { %v600_v0 = vcvt.f32.s32 %v599_v61 }
 0x2e7   : >> { %v603_v1 = vadd.s32 %v602_v62, %v600_v0 }
 0x2e8   : >> { %v614_v2 = vpop.xlane.xlu1 %613 }
 0x2e9   : >> { %vm619_vm9 = vcmp.eq.s32.totalorder %v1259_v18, %v603_v1  ;;  %v615_v4 = vcvt.f32.s32 %v614_v2 }
 0x2ea   : >> { %v705_v35 = vsel %vm619_vm9, -inf, %v1116_v35   ;;  %v844_v6 = vsel %vm619_vm9, 1.0, %v1128_v59 }
 0x2eb   : >> { %v618_v5 = vadd.s32 %v617_v3, %v615_v4 }
 0x2ed   : >> { %vm620_vm10 = vcmp.eq.s32.totalorder %v1259_v18, %v618_v5 }
 0x2ee   : >> { %v845_v7 = vsel %vm620_vm10, 1.0, %v1128_v59  ;;  %v706_v36 = vsel %vm620_vm10, -inf, %v1112_v36  }
 0x2ef   : >> { %v911_v8 = vpack.c.bf16 %v845_v7, %v844_v6 }
 0x2f1   : >> { %913 = vmatpush3.bf16.xpose.msk.msra.mxu0 %vm912_vm11, %v911_v8 }
 0x2f8   : >> { %894 = vmatmul.mubr.msk.f32.vlgmr.msra.gmra.mrb[0].mxu0 %vm578_vm3, %v1261_v21 }
 0x3ca   : > { %573 = sbr.rel (!%p571_p12) target bundleno = 304 (0x130), region = 85 }
 0x3cb   : >> { %v700_v9 = vpop.f32.mrb[0].mxu0 }
 0x3cc   : >> { %v701_v10 = vadd.f32 %v700_v9, %v1263_v27  ;;  %v895_v11 = vpop.f32.mrb[1].mxu0 }
 0x3ce   : >> { %v704_v12 = vmax.f32 %v1108_v37, %v701_v10  }
 0x3d0   : >> { %v1367_v37 = vmov %v704_v12  ;;  %708 = vst.msk [vmem:[%s257_s10] sm:$0xff] (%p571_p12), %vm578_vm3, %v704_v12 }
 0x3d1   : > { %1023 = shalt.err (!%p1020_p6)
}
 0x3d2   : > { %s1024_s21 = scalar_lea.hbm %s1312_s15, 128  ;;  %s1028_s9 = scalar_lea.hbm %s1362_s5, 256 }
 0x3d3   : > { %p1025_p7 = scmp.ne.s32.totalorder %s1312_s15, %s1024_s21  ;;  %p1029_p11 = scmp.lt.u32.totalorder %s1312_s15, %s1362_s5 }
 0x3d4   : > { %p1030_p12 = scmp.lt.u32.totalorder %s1028_s9, %s1024_s21  ;;  %p1032_p0 = scmp.lt.u32.totalorder %s1024_s21, %s1312_s15 }
 0x3d5   : > { %p1026_p9 = pnand %p1025_p7, %p1200_p4 }
 0x3d6   : > { %p1031_p13 = por %p1030_p12, %p1029_p11 }
 0x3d7   : > { %p1027_p10 = pneg %p1026_p9 }
 0x3d8   : > { %p1033_p1 = por %p1032_p0, %p1031_p13 }
 0x3da   : > { %p1034_p2 = pnand %p1033_p1, %p1027_p10 }
 0x3dc   : > { %1037 = shalt.err (!%p1034_p2)
}
 0x3dd   : > { %914 = dma.vmem_to_hbm [thread:$0]  (%p1200_p4), %s725_s16, 128, %s1312_s15, %s710_s17  }
 0x3de PF: > { %p920_p3 = scmp.ge.s32.totalorder %s1104_s23, 2  ;;  %s736_s12 = sand.u32 1, %s1084_s18  }
 0x3df   : > { %s737_s13 = scalar_lea.sflag [#allocation3], %s736_s12 }
 0x3e0   : > { %p917_p5 = pnand %p920_p3, %p1207_p8 }
 0x3e2   : > { %1079 = dma.done.wait (!%p917_p5), %s737_s13, 128  }
 0x3e3   : > { %1081 = vsyncadd (!%p917_p5), %s737_s13, 4294967168  ;;  %s18_s23 = sadd.s32 1, %s1104_s23   ;;  %s1368_s18 = smov %s1088_s19 }
 0x3e4   : > { %p15_p6 = scmp.ge.s32.totalorder %s18_s23, 4   ;;  %s1369_s19 = smov %s1092_s20 }
 0x3e5   : > { %s1370_s20 = smov %s1213_s6  ;;  %s1371_s21 = smov %s1100_s22 }
 0x3e6   : > { %s1372_s22 = smov %s1374_s26  ;;  %17 = sbr.rel (!%p15_p6) target bundleno = 4 (0x4), region = 96 }
 0x3ed   :  { %742 = vsyncpa [#allocation3], 1 }
 0x3ee   :  { %744 = vsyncpa [#allocation3 + $0x1], 1 }

</bundles_post_ra>
